<compile_context>
chip_gen: v6e
topology: v6e:2x2x1
jax: 0.10.0
libtpu: 0.0.40
codegen_flags: <defaults>
</compile_context>

<pallas_src>
import jax
import jax.numpy as jnp
from jax.experimental import pallas as pl
from jax.experimental.pallas import tpu as pltpu

TILE_HW = 512  # pixels per tile on the lane axis (multiple of 128)


def _round_up(x, m):
    return ((x + m - 1) // m) * m


# ----------------------------- Pallas kernel --------------------------------

def _mlp_kernel(x_ref, w1_ref, b1_ref, w2_ref, b2_ref, o_ref):
    # x_ref:  (Cin, THW)  f32  (cast to bf16 in-register)
    # w1_ref: (Hid, Cin)  bf16     b1_ref: (Hid, 1)  f32
    # w2_ref: (Cout, Hid) bf16     b2_ref: (Cout, 1) f32
    # o_ref:  (Cout, THW) f32
    x = x_ref[...].astype(jnp.bfloat16)
    h = jnp.dot(w1_ref[...], x, preferred_element_type=jnp.float32)
    h = jnp.clip(h + b1_ref[...], 0.0, 6.0)                 # fc1 bias + ReLU6 (f32)
    y = jnp.dot(w2_ref[...], h.astype(jnp.bfloat16),
                preferred_element_type=jnp.float32)
    o_ref[...] = (y + b2_ref[...]).astype(o_ref.dtype)      # fc2 bias


def mlp_forward(x_nchw, w1, b1, w2, b2, *, tile_hw=TILE_HW):
    """Fused Mlp forward.

    x_nchw: (B, Cin, H, W) f32          (PyTorch layout)
    w1: (Hid, Cin, 1, 1), b1: (Hid,)    (fc1, PyTorch Conv2d layout)
    w2: (Cout, Hid, 1, 1), b2: (Cout,)  (fc2)
    returns (B, Cout, H, W) f32
    """
    B, Cin, H, W = x_nchw.shape
    hid = w1.shape[0]
    cout = w2.shape[0]
    HW = H * W

    # NCHW -> (B, Cin, H*W): contiguous reshape, no data movement.
    x3 = x_nchw.reshape(B, Cin, HW)

    thw = min(tile_hw, _round_up(HW, 128))     # lane-dense tile (multiple of 128)
    HWp = _round_up(HW, thw)
    if HWp != HW:                              # pad only when needed
        x3 = jnp.pad(x3, ((0, 0), (0, 0), (0, HWp - HW)))

    # Conv2d weights are already (Cout, Cin, 1, 1) -> (Cout, Cin): no transpose.
    w1m = w1.reshape(hid, Cin).astype(jnp.bfloat16)
    w2m = w2.reshape(cout, hid).astype(jnp.bfloat16)
    b1m = b1.reshape(hid, 1).astype(jnp.float32)
    b2m = b2.reshape(cout, 1).astype(jnp.float32)

    grid = (B, HWp // thw)

    flops = 2 * B * HWp * (Cin * hid + hid * cout)
    bytes_accessed = (B * Cin * HWp * 4 + B * cout * HWp * 4
                      + 2 * (hid * Cin + cout * hid) + 4 * (hid + cout))

    out = pl.pallas_call(
        _mlp_kernel,
        out_shape=jax.ShapeDtypeStruct((B, cout, HWp), jnp.float32),
        grid=grid,
        in_specs=[
            pl.BlockSpec((pl.Squeezed(), Cin, thw), lambda b, j: (b, 0, j)),
            pl.BlockSpec((hid, Cin), lambda b, j: (0, 0)),    # resident in VMEM
            pl.BlockSpec((hid, 1), lambda b, j: (0, 0)),
            pl.BlockSpec((cout, hid), lambda b, j: (0, 0)),
            pl.BlockSpec((cout, 1), lambda b, j: (0, 0)),
        ],
        out_specs=pl.BlockSpec((pl.Squeezed(), cout, thw), lambda b, j: (b, 0, j)),
        compiler_params=pltpu.CompilerParams(
            dimension_semantics=("parallel", "parallel")),
        cost_estimate=pl.CostEstimate(
            flops=flops, transcendentals=0, bytes_accessed=bytes_accessed),
    )(x3, w1m, b1m, w2m, b2m)

    if HWp != HW:
        out = out[:, :, :HW]
    # Dropout (eval mode) is identity.
    return out.reshape(B, cout, H, W)


# --------------------------- pure-JAX reference ------------------------------

def mlp_reference(x_nchw, w1, b1, w2, b2):
    """Same math (including bf16 operand cast) in plain jnp, for validation."""
    B, Cin, H, W = x_nchw.shape
    hid, cout = w1.shape[0], w2.shape[0]
    x3 = x_nchw.reshape(B, Cin, H * W).astype(jnp.bfloat16)
    w1m = w1.reshape(hid, Cin).astype(jnp.bfloat16)
    w2m = w2.reshape(cout, hid).astype(jnp.bfloat16)
    h = jnp.einsum("hc,bcn->bhn", w1m, x3,
                   preferred_element_type=jnp.float32) + b1[None, :, None]
    h = jnp.clip(h, 0.0, 6.0).astype(jnp.bfloat16)
    y = jnp.einsum("oh,bhn->bon", w2m, h,
                   preferred_element_type=jnp.float32) + b2[None, :, None]
    return y.reshape(B, cout, H, W)


# ----------------------------------- main ------------------------------------

if __name__ == "__main__":
    B, Cin, H, W = 2, 32, 16, 16
    hidden = 128                    # mlp_ratio = 4
    Cout = Cin                      # out_features defaults to in_features

    key = jax.random.PRNGKey(0)
    k1, k2, k3, k4, k5 = jax.random.split(key, 5)
    x = jax.random.normal(k1, (B, Cin, H, W), jnp.float32)
    w1 = jax.random.normal(k2, (hidden, Cin, 1, 1), jnp.float32) / (float(Cin) ** 0.5)
    b1 = jax.random.normal(k3, (hidden,), jnp.float32) * 0.02
    w2 = jax.random.normal(k4, (Cout, hidden, 1, 1), jnp.float32) / (float(hidden) ** 0.5)
    b2 = jax.random.normal(k5, (Cout,), jnp.float32) * 0.02

    fwd = jax.jit(mlp_forward)
    out = jax.block_until_ready(fwd(x, w1, b1, w2, b2))

    assert out.shape == (B, Cout, H, W), out.shape
    assert bool(jnp.all(jnp.isfinite(out)))

    ref = mlp_reference(x, w1, b1, w2, b2)
    max_err = float(jnp.max(jnp.abs(out - ref)))
    assert max_err < 5e-2, f"max abs error {max_err}"

    print("KERNEL_OK")
</pallas_src>

<mosaic_0001>
module attributes {stable_mosaic.version = 11 : i64} {
  func.func @_mlp_kernel(%arg0: i32, %arg1: i32, %arg2: memref<1x32x256xf32, #tpu.memory_space<vmem>>, %arg3: memref<128x32xbf16, #tpu.memory_space<vmem>>, %arg4: memref<128x1xf32, #tpu.memory_space<vmem>>, %arg5: memref<32x128xbf16, #tpu.memory_space<vmem>>, %arg6: memref<32x1xf32, #tpu.memory_space<vmem>>, %arg7: memref<1x32x256xf32, #tpu.memory_space<vmem>>) attributes {dimension_semantics = [#tpu.dimension_semantics<parallel>, #tpu.dimension_semantics<parallel>], iteration_bounds = array<i64: 2, 1>, scalar_prefetch = 0 : i64, scratch_operands = 0 : i64, tpu.core_type = #tpu.core_type<tc>, window_params = [{transform_indices = @transform_0, window_bounds = array<i64: 1, 32, 256>}, {pipeline_mode = #tpu.pipeline_mode<synchronous>, transform_indices = @transform_1, window_bounds = array<i64: 128, 32>}, {pipeline_mode = #tpu.pipeline_mode<synchronous>, transform_indices = @transform_2, window_bounds = array<i64: 128, 1>}, {pipeline_mode = #tpu.pipeline_mode<synchronous>, transform_indices = @transform_3, window_bounds = array<i64: 32, 128>}, {pipeline_mode = #tpu.pipeline_mode<synchronous>, transform_indices = @transform_4, window_bounds = array<i64: 32, 1>}, {transform_indices = @transform_5, window_bounds = array<i64: 1, 32, 256>}]} {
    %c0 = arith.constant 0 : index
    %c0_0 = arith.constant 0 : index
    %c0_1 = arith.constant 0 : index
    %0 = vector.load %arg2[%c0, %c0_0, %c0_1] : memref<1x32x256xf32, #tpu.memory_space<vmem>>, vector<1x32x256xf32>
    %1 = vector.shape_cast %0 : vector<1x32x256xf32> to vector<32x256xf32>
    %2 = arith.truncf %1 : vector<32x256xf32> to vector<32x256xbf16>
    %c0_2 = arith.constant 0 : index
    %c0_3 = arith.constant 0 : index
    %3 = vector.load %arg3[%c0_2, %c0_3] : memref<128x32xbf16, #tpu.memory_space<vmem>>, vector<128x32xbf16>
    %cst = arith.constant dense<0.000000e+00> : vector<128x256xf32>
    %4 = tpu.matmul %3, %2, %cst {dimension_numbers = #tpu.dot_dimension_numbers<[1], [0], [0], [1], [0, 0, 1, 1], [], []>} : vector<128x32xbf16>, vector<32x256xbf16>, vector<128x256xf32> -> vector<128x256xf32>
    %c0_4 = arith.constant 0 : index
    %c0_5 = arith.constant 0 : index
    %5 = vector.load %arg4[%c0_4, %c0_5] : memref<128x1xf32, #tpu.memory_space<vmem>>, vector<128x1xf32>
    %6 = vector.broadcast %5 : vector<128x1xf32> to vector<128x256xf32>
    %7 = arith.addf %4, %6 : vector<128x256xf32>
    %cst_6 = arith.constant 0.000000e+00 : f32
    %cst_7 = arith.constant 6.000000e+00 : f32
    %8 = vector.broadcast %cst_6 : f32 to vector<128x256xf32>
    %9 = arith.maximumf %8, %7 : vector<128x256xf32>
    %10 = vector.broadcast %cst_7 : f32 to vector<128x256xf32>
    %11 = arith.minimumf %10, %9 : vector<128x256xf32>
    %c0_8 = arith.constant 0 : index
    %c0_9 = arith.constant 0 : index
    %12 = vector.load %arg5[%c0_8, %c0_9] : memref<32x128xbf16, #tpu.memory_space<vmem>>, vector<32x128xbf16>
    %13 = arith.truncf %11 : vector<128x256xf32> to vector<128x256xbf16>
    %cst_10 = arith.constant dense<0.000000e+00> : vector<32x256xf32>
    %14 = tpu.matmul %12, %13, %cst_10 {dimension_numbers = #tpu.dot_dimension_numbers<[1], [0], [0], [1], [0, 0, 1, 1], [], []>} : vector<32x128xbf16>, vector<128x256xbf16>, vector<32x256xf32> -> vector<32x256xf32>
    %c0_11 = arith.constant 0 : index
    %c0_12 = arith.constant 0 : index
    %15 = vector.load %arg6[%c0_11, %c0_12] : memref<32x1xf32, #tpu.memory_space<vmem>>, vector<32x1xf32>
    %16 = vector.broadcast %15 : vector<32x1xf32> to vector<32x256xf32>
    %17 = arith.addf %14, %16 : vector<32x256xf32>
    %c0_13 = arith.constant 0 : index
    %c0_14 = arith.constant 0 : index
    %c0_15 = arith.constant 0 : index
    %18 = vector.load %arg7[%c0_13, %c0_14, %c0_15] : memref<1x32x256xf32, #tpu.memory_space<vmem>>, vector<1x32x256xf32>
    %19 = vector.shape_cast %18 : vector<1x32x256xf32> to vector<32x256xf32>
    %20 = vector.shape_cast %17 : vector<32x256xf32> to vector<1x32x256xf32>
    tpu.vector_store %arg7[%c0_13, %c0_14, %c0_15], %20 {strides = array<i32>} : memref<1x32x256xf32, #tpu.memory_space<vmem>>, vector<1x32x256xf32>,
    return
  }
  func.func @transform_0(%arg0: i32, %arg1: i32) -> (i32, i32, i32) {
    %c0_i32 = arith.constant 0 : i32
    %c0_i32_0 = arith.constant 0 : i32
    return %arg0, %c0_i32, %arg1 : i32, i32, i32
  }
  func.func @transform_1(%arg0: i32, %arg1: i32) -> (i32, i32) {
    %c0_i32 = arith.constant 0 : i32
    %c0_i32_0 = arith.constant 0 : i32
    %c0_i32_1 = arith.constant 0 : i32
    return %c0_i32, %c0_i32_0 : i32, i32
  }
  func.func @transform_2(%arg0: i32, %arg1: i32) -> (i32, i32) {
    %c0_i32 = arith.constant 0 : i32
    %c0_i32_0 = arith.constant 0 : i32
    %c0_i32_1 = arith.constant 0 : i32
    return %c0_i32, %c0_i32_0 : i32, i32
  }
  func.func @transform_3(%arg0: i32, %arg1: i32) -> (i32, i32) {
    %c0_i32 = arith.constant 0 : i32
    %c0_i32_0 = arith.constant 0 : i32
    %c0_i32_1 = arith.constant 0 : i32
    return %c0_i32, %c0_i32_0 : i32, i32
  }
  func.func @transform_4(%arg0: i32, %arg1: i32) -> (i32, i32) {
    %c0_i32 = arith.constant 0 : i32
    %c0_i32_0 = arith.constant 0 : i32
    %c0_i32_1 = arith.constant 0 : i32
    return %c0_i32, %c0_i32_0 : i32, i32
  }
  func.func @transform_5(%arg0: i32, %arg1: i32) -> (i32, i32, i32) {
    %c0_i32 = arith.constant 0 : i32
    %c0_i32_0 = arith.constant 0 : i32
    return %arg0, %c0_i32, %arg1 : i32, i32, i32
  }
}

</mosaic_0001>

<bundles_post_ra>
// kernel: mlp_forward.1
= control target key start
LH: loop header
LB: loop body
LE: loop exit
PB: predicated region body
PF: predicated region fallthrough
CT: control target
= control target key end

     0   :  { %s958_s18 = smov 0   ;;  %s960_s19 = smov 0   ;;  %s1213_s0 = inlined_call_operand.vmem [shape: f32[2,32,256], index: 0, kind: input, shape index: {}]   ;;  %s1214_s1 = inlined_call_operand.vmem [shape: bf16[128,32], index: 1, kind: input, shape index: {}]   ;;  %s1215_s2 = inlined_call_operand.vmem [shape: f32[128,1], index: 2, kind: input, shape index: {}]   ;;  %s1216_s3 = inlined_call_operand.vmem [shape: bf16[32,128], index: 3, kind: input, shape index: {}]   ;;  %s1217_s4 = inlined_call_operand.vmem [shape: f32[32,1], index: 4, kind: input, shape index: {}]   ;;  %s1218_s5 = inlined_call_operand.vmem [shape: f32[2,32,256], index: 5, kind: output, shape index: {}]  }
   0x1   :  { %s962_s20 = smov 0  }
   0x2 LB: > { %s27_s21 = sadd.s32 1, %s921_s19  ;;  %p839_p0 = scmp.ge.s32.totalorder %s925_s20, 1  ;;  %s925_s20 = sphi %s962_s20, %s15_s20   ;;  %s921_s19 = sphi %s960_s19, %s1220_s19   ;;  %s917_s18 = sphi %s958_s18, %s1219_s18  }
   0x3   : > { %p29_p1 = scmp.ge.s32.totalorder %s27_s21, 2  ;;  %p208_p2 = scmp.lt.s32.totalorder %s925_s20, 3 }
   0x5   : > { %s1222_s21 = smov (%p29_p1, %s27_s21), 0  ;;  %p209_p3 = pnand %p839_p0, %p208_p2 }
   0x6   : > { %p245_p4 = scmp.lt.s32.totalorder (!%p209_p3), %s917_s18, 1 }
   0x7   : > { %212 = sbr.rel (%p209_p3) target bundleno = 531 (0x213), region = 40 }
   0xc   : > { %v927_v0 = vmov 0   ;;  %s1224_s18 = smov (!%p245_p4, %s917_s18), 1  ;;  %v307_v12 = vld [vmem:[%s1215_s2 + $0x70] sm:$0xff]  ;;  %v305_v13 = vld [vmem:[%s1215_s2 + $0x60] sm:$0xff]  ;;  %v308_v15 = vld [vmem:[%s1215_s2 + $0x78] sm:$0xff]  ;;  %vm429_vm0 = vcmask 261120  }
   0xd   : > { %486 = vmatprep.mubr.bf16.mxu0 %v927_v0  ;;  %891 = vset.pattern.permute.xlu0 %v927_v0  ;;  %s864_s22 = sshll.u32 %s1224_s18, 6  ;;  %v306_v16 = vld [vmem:[%s1215_s2 + $0x68] sm:$0xff]  ;;  %v893_v17 = vld [vmem:[%s1214_s1] sm:$0xff]   ;;  %v303_v18 = vld [vmem:[%s1215_s2 + $0x50] sm:$0xff] }
   0xe   : > { %892 = vset.pattern.permute.xlu1 %v927_v0  ;;  %719 = vmatprep.mubr.bf16.mxu1 %v927_v0  ;;  %s252_s25 = scalar_lea.vmem %s1213_s0, %s864_s22  ;;  %v304_v19 = vld [vmem:[%s1215_s2 + $0x58] sm:$0xff]  ;;  %v301_v20 = vld [vmem:[%s1215_s2 + $0x40] sm:$0xff]  ;;  %v302_v21 = vld [vmem:[%s1215_s2 + $0x48] sm:$0xff]  ;;  %s262_s28 = scalar_lea.vmem %s1218_s5, %s864_s22 }
   0xf   : > { %v270_v1 = vld [vmem:[%s252_s25 + $0x28] sm:$0xff]  ;;  %v272_v2 = vld [vmem:[%s252_s25 + $0x38] sm:$0xff]  ;;  %v269_v3 = vld [vmem:[%s252_s25 + $0x20] sm:$0xff]  ;;  %381 = vperm.xlu0 %891, %v307_v12   ;;  %371 = vperm.xlu1 %892, %v305_v13  }
  0x10   : > { %v276_v4 = vpack.c.bf16 %v272_v2, %v270_v1  ;;  %v271_v5 = vld [vmem:[%s252_s25 + $0x30] sm:$0xff]  ;;  %v266_v6 = vld [vmem:[%s252_s25 + $0x8] sm:$0xff]  ;;  %v268_v7 = vld [vmem:[%s252_s25 + $0x18] sm:$0xff] }
  0x11   : > { %v275_v8 = vpack.c.bf16 %v271_v5, %v269_v3  ;;  %v274_v9 = vpack.c.bf16 %v268_v7, %v266_v6  ;;  %v265_v10 = vld [vmem:[%s252_s25] sm:$0xff]  ;;  %v267_v11 = vld [vmem:[%s252_s25 + $0x10] sm:$0xff]  ;;  %v894_v22 = vld [vmem:[%s1214_s1 + $0x8] sm:$0xff]  }
  0x12   : > { %466 = vmatprep.subr.bf16.mxu0 %v276_v4  ;;  %v273_v14 = vpack.c.bf16 %v267_v11, %v265_v10  ;;  %v299_v23 = vld [vmem:[%s1215_s2 + $0x30] sm:$0xff]  ;;  %v300_v24 = vld [vmem:[%s1215_s2 + $0x38] sm:$0xff]  ;;  %v297_v25 = vld [vmem:[%s1215_s2 + $0x20] sm:$0xff] }
  0x13   : > { %467 = vmatpush1.bf16.msra.mxu0 %v275_v8  ;;  %386 = vperm.xlu0 %891, %v308_v15   ;;  %v298_v26 = vld [vmem:[%s1215_s2 + $0x28] sm:$0xff]  ;;  %v895_v27 = vld [vmem:[%s1214_s1 + $0x10] sm:$0xff]   ;;  %v296_v29 = vld [vmem:[%s1215_s2 + $0x18] sm:$0xff] }
  0x14   : > { %468 = vmatprep.subr.bf16.mxu0 %v274_v9  ;;  %376 = vperm.xlu1 %892, %v306_v16   ;;  %v295_v28 = vld [vmem:[%s1215_s2 + $0x10] sm:$0xff]  ;;  %v293_v30 = vld [vmem:[%s1215_s2] sm:$0xff]  ;;  %v294_v31 = vld [vmem:[%s1215_s2 + $0x8] sm:$0xff] }
  0x15   : > { %v896_v32 = vld [vmem:[%s1214_s1 + $0x18] sm:$0xff]   ;;  %v651_v33 = vld [vmem:[%s1217_s4] sm:$0xff]  ;;  %v652_v34 = vld [vmem:[%s1217_s4 + $0x8] sm:$0xff] }
  0x16   : > { %v653_v35 = vld [vmem:[%s1217_s4 + $0x10] sm:$0xff]  ;;  %v654_v36 = vld [vmem:[%s1217_s4 + $0x18] sm:$0xff]  ;;  %v897_v37 = vld [vmem:[%s1214_s1 + $0x20] sm:$0xff]  }
  0x17   : > { %469 = vmatpush1.bf16.msra.mxu0 %v273_v14  ;;  %361 = vperm.xlu0 %891, %v303_v18   ;;  %v898_v38 = vld [vmem:[%s1214_s1 + $0x28] sm:$0xff]   ;;  %v899_v39 = vld [vmem:[%s1214_s1 + $0x30] sm:$0xff]   ;;  %v900_v40 = vld [vmem:[%s1214_s1 + $0x38] sm:$0xff]  }
  0x18   : > { %366 = vperm.xlu1 %892, %v304_v19  }
  0x1a   : > { %852 = vmatmul.mubr.msk.bf16.vlgmr.msra.gmra.mxu0 %vm429_vm0, %v893_v17 }
  0x1b   : > { %496 = vmatprep.mubr.bf16.mxu0 %v927_v0  ;;  %351 = vperm.xlu0 %891, %v301_v20  }
  0x1c   : > { %356 = vperm.xlu1 %892, %v302_v21  }
  0x1f   : > { %341 = vperm.xlu0 %891, %v299_v23  }
  0x20   : > { %346 = vperm.xlu1 %892, %v300_v24  }
  0x22   : > { %853 = vmatmul.mubr.msk.bf16.gmra.mxu0 %vm429_vm0, %v894_v22 }
  0x23   : > { %506 = vmatprep.mubr.bf16.mxu0 %v927_v0  ;;  %331 = vperm.xlu0 %891, %v297_v25  }
  0x24   : > { %336 = vperm.xlu1 %892, %v298_v26  }
  0x27   : > { %321 = vperm.xlu0 %891, %v295_v28  }
  0x28   : > { %326 = vperm.xlu1 %892, %v296_v29  }
  0x2a   : > { %854 = vmatmul.mubr.msk.bf16.gmra.mxu0 %vm429_vm0, %v895_v27 }
  0x2b   : > { %516 = vmatprep.mubr.bf16.mxu0 %v927_v0  ;;  %311 = vperm.xlu0 %891, %v293_v30  }
  0x2c   : > { %316 = vperm.xlu1 %892, %v294_v31  }
  0x2f   : > { %657 = vperm.xlu0 %891, %v651_v33  }
  0x30   : > { %662 = vperm.xlu1 %892, %v652_v34  }
  0x32   : > { %855 = vmatmul.mubr.msk.bf16.gmra.mxu0 %vm429_vm0, %v896_v32 }
  0x33   : > { %526 = vmatprep.mubr.bf16.mxu0 %v927_v0  ;;  %667 = vperm.xlu0 %891, %v653_v35  }
  0x34   : > { %672 = vperm.xlu1 %892, %v654_v36  }
  0x3a   : > { %856 = vmatmul.mubr.msk.bf16.gmra.mxu0 %vm429_vm0, %v897_v37 }
  0x3b   : > { %536 = vmatprep.mubr.bf16.mxu0 %v927_v0 }
  0x42   : > { %857 = vmatmul.mubr.msk.bf16.gmra.mxu0 %vm429_vm0, %v898_v38 }
  0x43   : > { %546 = vmatprep.mubr.bf16.mxu0 %v927_v0 }
  0x4a   : > { %858 = vmatmul.mubr.msk.bf16.gmra.mxu0 %vm429_vm0, %v899_v39 }
  0x4b   : > { %556 = vmatprep.mubr.bf16.mxu0 %v927_v0 }
  0x52   : > { %859 = vmatmul.mubr.msk.bf16.gmra.mxu0 %vm429_vm0, %v900_v40 }
  0x8a   : > { %v1087_v41 = vpop.permute.xlu0 %381  ;;  %v1089_v42 = vpop.permute.xlu1 %371 }
  0x8e   : > { %v1091_v43 = vpop.permute.xlu0 %386 }
  0x8f   : > { %v1093_v44 = vpop.permute.xlu1 %376 }
  0x92   : > { %v1095_v45 = vpop.permute.xlu0 %361 }
  0x93   : > { %v1097_v46 = vpop.permute.xlu1 %366 }
  0x96   : > { %v1099_v47 = vpop.permute.xlu0 %351 }
  0x97   : > { %v1101_v48 = vpop.permute.xlu1 %356 }
  0x9a   : > { %v1103_v49 = vpop.permute.xlu0 %341 }
  0x9b   : > { %v1105_v50 = vpop.permute.xlu1 %346 }
  0x9e   : > { %v1107_v51 = vpop.permute.xlu0 %331 }
  0x9f   : > { %v1109_v52 = vpop.permute.xlu1 %336 }
  0xa2   : > { %v322_v53 = vpop.permute.xlu0 %321 }
  0xa3   : > { %v327_v54 = vpop.permute.xlu1 %326 }
  0xa6   : > { %v312_v55 = vpop.permute.xlu0 %311 }
  0xa7   : > { %v317_v59 = vpop.permute.xlu1 %316 }
  0xda   : > { %v488_v56 = vpop.f32.mrf.mxu0 }
  0xdb   : > { %v489_v57 = vadd.f32 %v488_v56, %v312_v55 }
  0xdc   : > { %v490_v58 = vpop.f32.mrf.mxu0 }
  0xdd   : > { %v491_v60 = vadd.f32 %v490_v58, %v312_v55  ;;  %v567_v62 = vmax.f32 %v489_v57, 0.0 }
  0xde   : > { %v492_v61 = vpop.f32.mrf.mxu0 }
  0xdf   : > { %v493_v63 = vadd.f32 %v492_v61, %v317_v59  ;;  %v568_v2 = vmax.f32 %v491_v60, 0.0  ;;  %v1111_v6 = vmin.f32 %v567_v62, 6.0 }
  0xe0   : > { %v494_v1 = vpop.f32.mrf.mxu0 }
  0xe1   : > { %v569_v3 = vmax.f32 %v493_v63, 0.0  ;;  %v495_v4 = vadd.f32 %v494_v1, %v317_v59  ;;  %v1115_v11 = vmin.f32 %v568_v2, 6.0 }
  0xe2   : > { %v498_v5 = vpop.f32.mrf.mxu0 }
  0xe3   : > { %v1113_v7 = vmin.f32 %v569_v3, 6.0  ;;  %v570_v8 = vmax.f32 %v495_v4, 0.0  ;;  %v499_v9 = vadd.f32 %v498_v5, %v322_v53 }
  0xe4   : > { %v500_v10 = vpop.f32.mrf.mxu0 }
  0xe5   : > { %v635_v12 = vpack.c.bf16 %v1113_v7, %v1111_v6  ;;  %v1119_v13 = vmin.f32 %v570_v8, 6.0  ;;  %v501_v14 = vadd.f32 %v500_v10, %v322_v53  ;;  %v571_v17 = vmax.f32 %v499_v9, 0.0  ;;  %v663_v7 = vpop.permute.xlu1 %662 }
  0xe6   : > { %v502_v15 = vpop.f32.mrf.mxu0 }
  0xe7   : > { %v636_v16 = vpack.c.bf16 %v1119_v13, %v1115_v11  ;;  %v503_v18 = vadd.f32 %v502_v15, %v327_v54  ;;  %v572_v20 = vmax.f32 %v501_v14, 0.0  ;;  %v1125_v24 = vmin.f32 %v571_v17, 6.0 }
  0xe8   : > { %v504_v19 = vpop.f32.mrf.mxu0 }
  0xe9   : > { %v573_v21 = vmax.f32 %v503_v18, 0.0  ;;  %v505_v22 = vadd.f32 %v504_v19, %v327_v54  ;;  %v1131_v28 = vmin.f32 %v572_v20, 6.0 }
  0xea   : > { %v1123_v23 = vpop.f32.mrf.mxu0 }
  0xeb   : > { %v1127_v25 = vmin.f32 %v573_v21, 6.0  ;;  %v574_v26 = vmax.f32 %v505_v22, 0.0 }
  0xec   : > { %v1129_v27 = vpop.f32.mrf.mxu0 }
  0xed   : > { %v637_v29 = vpack.c.bf16 %v1127_v25, %v1125_v24  ;;  %v1135_v30 = vmin.f32 %v574_v26, 6.0  ;;  %v902_v24 = vld [vmem:[%s1216_s3 + $0x8] sm:$0xff]   ;;  %v658_v25 = vpop.permute.xlu0 %657 }
  0xee   : > { %v1137_v31 = vpop.f32.mrf.mxu0 }
  0xef   : > { %v638_v32 = vpack.c.bf16 %v1135_v30, %v1131_v28 }
  0xf0   : > { %v1141_v33 = vpop.f32.mrf.mxu0 }
  0xf1   : > { %v668_v30 = vpop.permute.xlu0 %667 }
  0xf2   : > { %v1143_v34 = vpop.f32.mrf.mxu0 }
  0xf4   : > { %v1145_v35 = vpop.f32.mrf.mxu0 }
  0xf6   : > { %v1147_v36 = vpop.f32.mrf.mxu0 }
  0xf8   : > { %v524_v37 = vpop.f32.mrf.mxu0 }
  0xfa   : > { %v528_v38 = vpop.f32.mrf.mxu0 }
  0xfc   : > { %v530_v39 = vpop.f32.mrf.mxu0 }
  0xfe   : > { %v532_v40 = vpop.f32.mrf.mxu0 }
 0x100   : > { %v534_v53 = vpop.f32.mrf.mxu0 }
 0x102   : > { %v538_v54 = vpop.f32.mrf.mxu0 }
 0x104   : > { %v540_v55 = vpop.f32.mrf.mxu0 }
 0x106   : > { %v542_v56 = vpop.f32.mrf.mxu0 }
 0x108   : > { %v544_v57 = vpop.f32.mrf.mxu0 }
 0x109   : > { %v545_v9 = vadd.f32 %v544_v57, %v1097_v46 }
 0x10a   : > { %v548_v58 = vpop.f32.mrf.mxu0 }
 0x10b   : > { %v549_v20 = vadd.f32 %v548_v58, %v1089_v42 }
 0x10c   : > { %v550_v59 = vpop.f32.mrf.mxu0 }
 0x10d   : > { %v551_v5 = vadd.f32 %v550_v59, %v1089_v42  ;;  %v535_v59 = vadd.f32 %v534_v53, %v1101_v48  ;;  %v531_v42 = vadd.f32 %v530_v39, %v1099_v47  ;;  %v521_v39 = vadd.f32 %v1145_v35, %v1103_v49 }
 0x10e   : > { %v552_v60 = vpop.f32.mrf.mxu0 }
 0x10f   : > { %v553_v10 = vadd.f32 %v552_v60, %v1093_v44  ;;  %v592_v22 = vmax.f32 %v551_v5, 0.0  ;;  %v533_v5 = vadd.f32 %v532_v40, %v1101_v48  ;;  %v523_v48 = vadd.f32 %v1147_v36, %v1105_v50 }
 0x110   : > { %v554_v61 = vpop.f32.mrf.mxu0  ;;  %v513_v36 = vadd.f32 %v1137_v31, %v1109_v52 }
 0x111   : > { %v555_v1 = vadd.f32 %v554_v61, %v1093_v44  ;;  %v543_v61 = vadd.f32 %v542_v56, %v1097_v46  ;;  %v593_v57 = vmax.f32 %v553_v10, 0.0  ;;  %v590_v44 = vmax.f32 %v545_v9, 0.0 }
 0x112   : > { %v558_v62 = vpop.f32.mrf.mxu0  ;;  %v525_v56 = vadd.f32 %v524_v37, %v1105_v50  ;;  %v586_v9 = vmax.f32 %v535_v59, 0.0  ;;  %v585_v40 = vmax.f32 %v533_v5, 0.0  ;;  %v580_v59 = vmax.f32 %v521_v39, 0.0 }
 0x113   : > { %v559_v3 = vadd.f32 %v558_v62, %v1087_v41  ;;  %v594_v15 = vmax.f32 %v555_v1, 0.0  ;;  %v589_v53 = vmax.f32 %v543_v61, 0.0  ;;  %v622_v10 = vmin.f32 %v590_v44, 6.0 }
 0x114   : > { %v560_v63 = vpop.f32.mrf.mxu0  ;;  %v581_v61 = vmax.f32 %v523_v48, 0.0 }
 0x115   : > { %v561_v2 = vadd.f32 %v560_v63, %v1087_v41  ;;  %v595_v21 = vmax.f32 %v559_v3, 0.0  ;;  %v541_v41 = vadd.f32 %v540_v55, %v1095_v45  ;;  %v626_v60 = vmin.f32 %v594_v15, 6.0 }
 0x116   : > { %v562_v4 = vpop.f32.mrf.mxu0  ;;  %v624_v55 = vmin.f32 %v592_v22, 6.0  ;;  %v621_v37 = vmin.f32 %v589_v53, 6.0 }
 0x117   : > { %v563_v8 = vadd.f32 %v562_v4, %v1091_v43  ;;  %v596_v17 = vmax.f32 %v561_v2, 0.0  ;;  %v539_v2 = vadd.f32 %v538_v54, %v1095_v45  ;;  %v627_v4 = vmin.f32 %v595_v21, 6.0 }
 0x118   : > { %v564_v14 = vpop.f32.mrf.mxu0  ;;  %v588_v58 = vmax.f32 %v541_v41, 0.0  ;;  %v529_v45 = vadd.f32 %v528_v38, %v1099_v47  ;;  %v582_v21 = vmax.f32 %v525_v56, 0.0  ;;  %v618_v47 = vmin.f32 %v586_v9, 6.0 }
 0x119   : > { %v597_v18 = vmax.f32 %v563_v8, 0.0  ;;  %v565_v19 = vadd.f32 %v564_v14, %v1091_v43  ;;  %v628_v63 = vmin.f32 %v596_v17, 6.0  ;;  %v591_v43 = vmax.f32 %v549_v20, 0.0 }
 0x11a   : > { %v625_v8 = vmin.f32 %v593_v57, 6.0  ;;  %v648_v14 = vpack.c.bf16 %v626_v60, %v624_v55  ;;  %v587_v54 = vmax.f32 %v539_v2, 0.0  ;;  %v584_v17 = vmax.f32 %v531_v42, 0.0 }
 0x11b   : > { %v598_v26 = vmax.f32 %v565_v19, 0.0  ;;  %v629_v62 = vmin.f32 %v597_v18, 6.0  ;;  %v623_v15 = vmin.f32 %v591_v43, 6.0  ;;  %v620_v18 = vmin.f32 %v588_v58, 6.0 }
 0x11c   : > { %v515_v20 = vadd.f32 %v1141_v33, %v1109_v52  ;;  %v519_v41 = vadd.f32 %v1143_v34, %v1103_v49  ;;  %v583_v22 = vmax.f32 %v529_v45, 0.0  ;;  %v619_v35 = vmin.f32 %v587_v54, 6.0 }
 0x11d   : > { %v630_v1 = vmin.f32 %v598_v26, 6.0  ;;  %v649_v46 = vpack.c.bf16 %v629_v62, %v627_v4  ;;  %v647_v19 = vpack.c.bf16 %v625_v8, %v623_v15  ;;  %v646_v38 = vpack.c.bf16 %v622_v10, %v620_v18  ;;  %v901_v8 = vld [vmem:[%s1216_s3] sm:$0xff]   ;;  %v673_v10 = vpop.permute.xlu1 %672 }
 0x11e   : > { %v511_v26 = vadd.f32 %v1129_v27, %v1107_v51  ;;  %v616_v50 = vmin.f32 %v584_v17, 6.0  ;;  %v617_v33 = vmin.f32 %v585_v40, 6.0  ;;  %v645_v57 = vpack.c.bf16 %v621_v37, %v619_v35 }
 0x11f   : > { %v650_v3 = vpack.c.bf16 %v630_v1, %v628_v63  ;;  %v578_v62 = vmax.f32 %v515_v20, 0.0  ;;  %v614_v44 = vmin.f32 %v582_v21, 6.0  ;;  %v509_v49 = vadd.f32 %v1123_v23, %v1107_v51 }
 0x120   : > { %v644_v60 = vpack.c.bf16 %v618_v47, %v616_v50  ;;  %v579_v34 = vmax.f32 %v519_v41, 0.0  ;;  %v615_v63 = vmin.f32 %v583_v22, 6.0  ;;  %v576_v1 = vmax.f32 %v511_v26, 0.0 }
 0x121   : > { %687 = vmatprep.subr.bf16.mxu1 %v650_v3  ;;  %v612_v27 = vmin.f32 %v580_v59, 6.0  ;;  %v577_v2 = vmax.f32 %v513_v36, 0.0  ;;  %v613_v43 = vmin.f32 %v581_v61, 6.0  ;;  %v610_v42 = vmin.f32 %v578_v62, 6.0 }
 0x122   : > { %688 = vmatpush1.bf16.msra.mxu1 %v649_v46  ;;  %v643_v4 = vpack.c.bf16 %v617_v33, %v615_v63  ;;  %v575_v31 = vmax.f32 %v509_v49, 0.0  ;;  %v611_v58 = vmin.f32 %v579_v34, 6.0  ;;  %v608_v55 = vmin.f32 %v576_v1, 6.0 }
 0x123   : > { %689 = vmatprep.subr.bf16.mxu1 %v648_v14  ;;  %v642_v52 = vpack.c.bf16 %v614_v44, %v612_v27  ;;  %v609_v3 = vmin.f32 %v577_v2, 6.0 }
 0x124   : > { %v641_v5 = vpack.c.bf16 %v613_v43, %v611_v58  ;;  %v640_v53 = vpack.c.bf16 %v610_v42, %v608_v55  ;;  %v607_v51 = vmin.f32 %v575_v31, 6.0 }
 0x126   : > { %690 = vmatpush1.bf16.msra.mxu1 %v647_v19  ;;  %v639_v23 = vpack.c.bf16 %v609_v3, %v607_v51 }
 0x127   : > { %691 = vmatprep.subr.bf16.mxu1 %v646_v38 }
 0x12a   : > { %692 = vmatpush1.bf16.msra.mxu1 %v645_v57 }
 0x12b   : > { %693 = vmatprep.subr.bf16.mxu1 %v644_v60 }
 0x12e   : > { %694 = vmatpush1.bf16.msra.mxu1 %v643_v4 }
 0x12f   : > { %695 = vmatprep.subr.bf16.mxu1 %v642_v52 }
 0x132   : > { %696 = vmatpush1.bf16.msra.mxu1 %v641_v5 }
 0x133   : > { %697 = vmatprep.subr.bf16.mxu1 %v640_v53 }
 0x136   : > { %698 = vmatpush1.bf16.msra.mxu1 %v639_v23 }
 0x137   : > { %699 = vmatprep.subr.bf16.mxu1 %v638_v32 }
 0x13a   : > { %700 = vmatpush1.bf16.msra.mxu1 %v637_v29 }
 0x13b   : > { %701 = vmatprep.subr.bf16.mxu1 %v636_v16 }
 0x13e   : > { %702 = vmatpush1.bf16.msra.mxu1 %v635_v12 }
 0x141   : > { %720 = vmatmul.mubr.bf16.vlgmr.msra.gmra.mxu1 %v901_v8 }
 0x142   : > { %729 = vmatprep.mubr.bf16.mxu1 %v927_v0 }
 0x149   : > { %730 = vmatmul.mubr.bf16.gmra.mxu1 %v902_v24 }
 0x201   : > { %v721_v11 = vpop.f32.mrf.mxu1 }
 0x202   : > { %v722_v13 = vadd.f32 %v721_v11, %v658_v25 }
 0x203   : > { %v723_v16 = vpop.f32.mrf.mxu1 }
 0x204   : > { %740 = vst [vmem:[%s262_s28] sm:$0xff] %v722_v13  ;;  %v724_v6 = vadd.f32 %v723_v16, %v658_v25 }
 0x205   : > { %v725_v12 = vpop.f32.mrf.mxu1 }
 0x206   : > { %741 = vst [vmem:[%s262_s28 + $0x8] sm:$0xff] %v724_v6  ;;  %v726_v0 = vadd.f32 %v725_v12, %v663_v7 }
 0x207   : > { %v727_v28 = vpop.f32.mrf.mxu1 }
 0x208   : > { %742 = vst [vmem:[%s262_s28 + $0x10] sm:$0xff] %v726_v0  ;;  %v728_v29 = vadd.f32 %v727_v28, %v663_v7 }
 0x209   : > { %v731_v32 = vpop.f32.mrf.mxu1 }
 0x20a   : > { %743 = vst [vmem:[%s262_s28 + $0x18] sm:$0xff] %v728_v29  ;;  %v732_v46 = vadd.f32 %v731_v32, %v668_v30 }
 0x20b   : > { %v733_v56 = vpop.f32.mrf.mxu1 }
 0x20c   : > { %744 = vst [vmem:[%s262_s28 + $0x20] sm:$0xff] %v732_v46  ;;  %v734_v9 = vadd.f32 %v733_v56, %v668_v30 }
 0x20d   : > { %v735_v14 = vpop.f32.mrf.mxu1 }
 0x20e   : > { %745 = vst [vmem:[%s262_s28 + $0x28] sm:$0xff] %v734_v9  ;;  %v736_v45 = vadd.f32 %v735_v14, %v673_v10 }
 0x20f   : > { %v737_v54 = vpop.f32.mrf.mxu1 }
 0x210   : > { %746 = vst [vmem:[%s262_s28 + $0x30] sm:$0xff] %v736_v45  ;;  %v738_v15 = vadd.f32 %v737_v54, %v673_v10 }
 0x212   : > { %747 = vst [vmem:[%s262_s28 + $0x38] sm:$0xff] %v738_v15 }
 0x213 PF: > { %s15_s20 = sadd.s32 1, %s925_s20   ;;  %s1219_s18 = smov %s921_s19 }
 0x214   : > { %p12_p5 = scmp.ge.s32.totalorder %s15_s20, 4   ;;  %s1220_s19 = smov %s1222_s21 }
 0x216   :  { %14 = sbr.rel (!%p12_p5) target bundleno = 2 (0x2), region = 70 }

</bundles_post_ra>
